<compile_context>
chip_gen: v5e
topology: v5e:2x2
jax: 0.10.0
libtpu: 0.0.40
codegen_flags: <defaults>
</compile_context>

<pallas_src>
import functools

import jax
import jax.numpy as jnp
from jax.experimental import pallas as pl
from jax.experimental.pallas import tpu as pltpu


# ----------------------------------------------------------------------------- kernel body


def _kpn_kernel(kflat_ref, dpad_ref, out_ref, *scratch, K, TH, W, mul_dtype):
    # kflat_ref: (K*K, TH, W)  per-pixel kernel planes for this (batch, H-tile), streamed once
    # dpad_ref:  (C, Hp, Wp)   zero-padded image plane for this batch (VMEM resident)
    # out_ref:   (C, TH, W)    output block; doubles as the f32 accumulator when out dtype is f32
    # scratch:   optional f32 accumulator (only when out dtype is not f32)
    acc_ref = scratch[0] if scratch else out_ref
    h = pl.program_id(1)
    row0 = h * TH

    acc_ref[...] = jnp.zeros_like(acc_ref)

    # Reduction over the kernel row shift i happens in-kernel (no grid steps).
    @pl.loop(0, K)
    def _(i):
        part = None
        for j in range(K):  # static unroll over the column shift only (K terms, not K*K)
            # Flip over (i, j) is a pure index permutation -- never materialized.
            kplane = kflat_ref[(K - 1 - i) * K + (K - 1 - j)].astype(mul_dtype)        # (TH, W)
            # Direct ref load per (i, j): no materialized slab slices (spare vld slots).
            patch = dpad_ref[:, pl.ds(row0 + i, TH), pl.ds(j, W)].astype(mul_dtype)    # (C, TH, W)
            # Multiply in mul_dtype (packed bf16 on v6e/v7x), widen into the f32 accumulator.
            term = (kplane[None, :, :] * patch).astype(jnp.float32)
            part = term if part is None else part + term
        # Write back once per i to bound vreg live ranges across the K*K reduction.
        acc_ref[...] += part

    if scratch:
        out_ref[...] = acc_ref[...].astype(out_ref.dtype)


# ----------------------------------------------------------------------------- sizing helpers


def _vmem_capacity_bytes():
    try:
        return int(pltpu.get_tpu_info().vmem_capacity_bytes)
    except Exception:
        return 64 << 20  # v7x per-TensorCore size (smallest across v5e/v6e/v7x)


def _is_v5e():
    try:
        kind = jax.devices()[0].device_kind.lower()
    except Exception:
        return False
    return ("v5e" in kind) or ("v5 lite" in kind) or ("v5litepod" in kind)


def _working_set_bytes(th, *, C, H, W, K, stream_it, plane_it, out_it, use_scratch):
    """Whole VMEM working set for an H-tile of `th` rows."""
    Hp, Wp = H + K - 1, W + K - 1
    kern = 2 * K * K * th * W * stream_it   # streamed kernels block, double buffered
    plane = 2 * C * Hp * Wp * plane_it      # resident padded image plane, double buffered
    out = 2 * C * th * W * out_it           # output block, double buffered
    acc = C * th * W * 4 if use_scratch else 0
    return kern + plane + out + acc


def _auto_tile_h(budget, **kw):
    """Largest H-tile that divides H, satisfies the (8,128) block rule and fits `budget`."""
    H = kw["H"]
    cands = [d for d in range(H, 0, -1) if H % d == 0 and (d % 8 == 0 or d == H)]
    for th in cands:
        if _working_set_bytes(th, **kw) <= budget:
            return th
    return cands[-1]


# ----------------------------------------------------------------------------- public wrapper


def kernel_conv(data, kernels, *, kernel_size, tile_h=None, stream_dtype=None, mul_dtype=None):
    """Pallas implementation of KernelConv.forward(data, kernels).

    stream_dtype: dtype used for the HBM-streamed kernels tensor (e.g. jnp.bfloat16
      halves the dominant K^2*H*W HBM traffic).  None keeps the input dtype (bit-exact).
    mul_dtype: dtype of the per-element multiply.  Defaults to stream_dtype on chips
      with a bf16 VPU (v6e/v7x) and to float32 on v5e.  Accumulation is always f32 and
      the output keeps data.dtype.
    """
    B, C, H, W = data.shape
    Bk, K, K2, Hk, Wk = kernels.shape
    assert Bk == B and Hk == H and Wk == W
    assert K == kernel_size and K2 == kernel_size, "kernels dims must match kernel_size"
    assert kernel_size % 2 == 1, "kernel_size must be odd (KPN convention)"
    pad = kernel_size // 2

    out_dtype = jnp.dtype(data.dtype)
    stream_dtype = jnp.dtype(stream_dtype) if stream_dtype is not None else jnp.dtype(kernels.dtype)
    if mul_dtype is None:
        if stream_dtype == jnp.dtype(jnp.bfloat16) and not _is_v5e():
            mul_dtype = jnp.bfloat16    # packed bf16 VALU on v6e / v7x
        else:
            mul_dtype = jnp.float32     # v5e has no bf16 VALU; f32 inputs stay exact
    mul_dtype = jnp.dtype(mul_dtype)
    # Keep the resident plane in the multiply dtype when that is narrower (halves its
    # VMEM footprint -- important on v7x's 64 MiB/TC -- and avoids per-load converts).
    plane_dtype = mul_dtype if mul_dtype.itemsize < out_dtype.itemsize else out_dtype

    # Glue: zero-pad spatially (matches F.pad) and flatten the kernel taps; the (i, j)
    # flip is done purely by index permutation inside the kernel.
    dpad = jnp.pad(data.astype(plane_dtype), ((0, 0), (0, 0), (pad, pad), (pad, pad)))
    kflat = kernels.reshape(B, K * K, H, W).astype(stream_dtype)
    Hp, Wp = H + K - 1, W + K - 1

    acc_in_out = out_dtype == jnp.dtype(jnp.float32)
    size_kw = dict(C=C, H=H, W=W, K=K,
                   stream_it=stream_dtype.itemsize, plane_it=plane_dtype.itemsize,
                   out_it=out_dtype.itemsize, use_scratch=not acc_in_out)

    cap = _vmem_capacity_bytes()
    if tile_h is None:
        tile_h = _auto_tile_h(int(cap * 0.7), **size_kw)
    assert H % tile_h == 0, "tile_h must divide H"
    TH = tile_h
    n_h = H // TH
    need = _working_set_bytes(TH, **size_kw)
    vmem_limit = int(min(cap, max(2 * need, 32 << 20)))

    # TODO(synk): for W not a multiple of 128, a lane-dense (reshaped) output layout would
    # avoid masked partial stores; for very large images on v7x, single-buffering the
    # resident plane (or an overlapping-slab residency scheme) would cut its footprint.

    body = functools.partial(_kpn_kernel, K=K, TH=TH, W=W, mul_dtype=mul_dtype)
    scratch_shapes = [] if acc_in_out else [pltpu.VMEM((C, TH, W), jnp.float32)]

    out = pl.pallas_call(
        body,
        out_shape=jax.ShapeDtypeStruct((B, C, H, W), out_dtype),
        grid_spec=pltpu.PrefetchScalarGridSpec(
            num_scalar_prefetch=0,
            grid=(B, n_h),
            in_specs=[
                # all K*K per-pixel kernel planes of this H-tile, streamed once from HBM
                pl.BlockSpec((pl.Squeezed(), K * K, TH, W), lambda b, h: (b, 0, h, 0)),
                # full zero-padded image plane for batch b; block index does not depend
                # on h so it is DMA'd once per batch and stays resident in VMEM
                pl.BlockSpec((pl.Squeezed(), C, Hp, Wp), lambda b, h: (b, 0, 0, 0)),
            ],
            out_specs=pl.BlockSpec((pl.Squeezed(), C, TH, W), lambda b, h: (b, 0, h, 0)),
            scratch_shapes=scratch_shapes,
        ),
        compiler_params=pltpu.CompilerParams(
            dimension_semantics=("parallel", "parallel"),
            vmem_limit_bytes=vmem_limit),
    )(kflat, dpad)
    return out


# ----------------------------------------------------------------------------- reference


def kernel_conv_ref(data, kernels, *, kernel_size):
    """Pure-JAX reference, literal transcription of the PyTorch forward."""
    B, C, H, W = data.shape
    K = kernel_size
    pad = K // 2
    kflip = jnp.flip(kernels, axis=(1, 2)).reshape(B, K * K, H, W)
    dpad = jnp.pad(data, ((0, 0), (0, 0), (pad, pad), (pad, pad)))
    img_stack = jnp.stack(
        [dpad[:, :, i:i + H, j:j + W] for i in range(K) for j in range(K)],
        axis=2)                                   # [B, C, K*K, H, W]
    return jnp.sum(kflip[:, None] * img_stack, axis=2)


if __name__ == "__main__":
    # Small shapes consistent with the module: C must be 3 (kernels are expanded to
    # 3 color channels).  kernel_size=5 instead of 15 to keep the test small.
    B, C, H, W = 2, 3, 16, 16
    K = 5

    key = jax.random.PRNGKey(0)
    k_data, k_kern = jax.random.split(key)
    data = jax.random.normal(k_data, (B, C, H, W), dtype=jnp.float32)
    kernels = jax.random.normal(k_kern, (B, K, K, H, W), dtype=jnp.float32)

    ref = kernel_conv_ref(data, kernels, kernel_size=K)

    # 1) exact f32 path (auto tile, accumulate directly in the f32 output block)
    fn = jax.jit(functools.partial(kernel_conv, kernel_size=K))
    out = jax.block_until_ready(fn(data, kernels))
    assert out.shape == (B, C, H, W)
    assert jnp.allclose(out, ref, atol=1e-4, rtol=1e-4), "f32 path mismatch vs reference"

    # 2) multi-H-tile path with bf16-streamed kernels (dominant-HBM-stream optimization)
    fn_bf = jax.jit(functools.partial(kernel_conv, kernel_size=K, tile_h=8,
                                      stream_dtype=jnp.bfloat16))
    out_bf = jax.block_until_ready(fn_bf(data, kernels))
    err = float(jnp.max(jnp.abs(out_bf.astype(jnp.float32) - ref)))
    assert err < 0.5, f"bf16-stream path error too large: {err}"

    # 3) fully bf16 inputs (exercises the f32 scratch-accumulator branch)
    out_lp = jax.block_until_ready(
        jax.jit(functools.partial(kernel_conv, kernel_size=K))(
            data.astype(jnp.bfloat16), kernels.astype(jnp.bfloat16)))
    err_lp = float(jnp.max(jnp.abs(out_lp.astype(jnp.float32) - ref)))
    assert out_lp.dtype == jnp.bfloat16
    assert err_lp < 0.6, f"bf16-input path error too large: {err_lp}"

    print("KERNEL_OK")
</pallas_src>

<mosaic_0001>
module attributes {stable_mosaic.version = 11 : i64} {
  func.func @_kpn_kernel(%arg0: i32, %arg1: i32, %arg2: memref<1x25x16x16xf32, #tpu.memory_space<vmem>>, %arg3: memref<1x3x20x20xf32, #tpu.memory_space<vmem>>, %arg4: memref<1x3x16x16xf32, #tpu.memory_space<vmem>>) attributes {dimension_semantics = [#tpu.dimension_semantics<parallel>, #tpu.dimension_semantics<parallel>], iteration_bounds = array<i64: 2, 1>, scalar_prefetch = 0 : i64, scratch_operands = 0 : i64, tpu.core_type = #tpu.core_type<tc>, window_params = [{transform_indices = @transform_0, window_bounds = array<i64: 1, 25, 16, 16>}, {transform_indices = @transform_1, window_bounds = array<i64: 1, 3, 20, 20>}, {transform_indices = @transform_2, window_bounds = array<i64: 1, 3, 16, 16>}]} {
    %c16_i32 = arith.constant 16 : i32
    %0 = arith.muli %arg1, %c16_i32 : i32
    %cst = arith.constant 0.000000e+00 : f32
    %1 = vector.broadcast %cst : f32 to vector<3x16x16xf32>
    %c0 = arith.constant 0 : index
    %c0_0 = arith.constant 0 : index
    %c0_1 = arith.constant 0 : index
    %c0_2 = arith.constant 0 : index
    %2 = vector.load %arg4[%c0, %c0_0, %c0_1, %c0_2] : memref<1x3x16x16xf32, #tpu.memory_space<vmem>>, vector<1x3x16x16xf32>
    %3 = vector.shape_cast %2 : vector<1x3x16x16xf32> to vector<3x16x16xf32>
    %4 = vector.shape_cast %1 : vector<3x16x16xf32> to vector<1x3x16x16xf32>
    tpu.vector_store %arg4[%c0, %c0_0, %c0_1, %c0_2], %4 {strides = array<i32>} : memref<1x3x16x16xf32, #tpu.memory_space<vmem>>, vector<1x3x16x16xf32>,
    %c0_i32 = arith.constant 0 : i32
    %c5_i32 = arith.constant 5 : i32
    %5 = arith.addi %c0_i32, %c5_i32 : i32
    %c1_i32 = arith.constant 1 : i32
    scf.for %arg5 = %c0_i32 to %5 step %c1_i32  : i32 {
      %c1_i32_4 = arith.constant 1 : i32
      %6 = arith.muli %arg5, %c1_i32_4 : i32
      %c0_i32_5 = arith.constant 0 : i32
      %7 = arith.addi %c0_i32_5, %6 : i32
      %c4_i32 = arith.constant 4 : i32
      %8 = arith.subi %c4_i32, %7 : i32
      %c5_i32_6 = arith.constant 5 : i32
      %9 = arith.muli %8, %c5_i32_6 : i32
      %c4_i32_7 = arith.constant 4 : i32
      %10 = arith.addi %9, %c4_i32_7 : i32
      %c0_8 = arith.constant 0 : index
      %11 = arith.index_cast %10 : i32 to index
      %c0_9 = arith.constant 0 : index
      %c0_10 = arith.constant 0 : index
      %12 = vector.load %arg2[%c0_8, %11, %c0_9, %c0_10] : memref<1x25x16x16xf32, #tpu.memory_space<vmem>>, vector<1x1x16x16xf32>
      %13 = vector.shape_cast %12 : vector<1x1x16x16xf32> to vector<16x16xf32>
      %14 = arith.addi %0, %7 : i32
      %c0_11 = arith.constant 0 : index
      %c0_12 = arith.constant 0 : index
      %15 = arith.index_cast %14 : i32 to index
      %c0_13 = arith.constant 0 : index
      %16 = vector.load %arg3[%c0_11, %c0_12, %15, %c0_13] : memref<1x3x20x20xf32, #tpu.memory_space<vmem>>, vector<1x3x16x16xf32>
      %17 = vector.shape_cast %16 : vector<1x3x16x16xf32> to vector<3x16x16xf32>
      %18 = vector.shape_cast %13 : vector<16x16xf32> to vector<1x16x16xf32>
      %19 = vector.broadcast %18 : vector<1x16x16xf32> to vector<3x16x16xf32>
      %20 = arith.mulf %19, %17 : vector<3x16x16xf32>
      %c4_i32_14 = arith.constant 4 : i32
      %21 = arith.subi %c4_i32_14, %7 : i32
      %c5_i32_15 = arith.constant 5 : i32
      %22 = arith.muli %21, %c5_i32_15 : i32
      %c3_i32 = arith.constant 3 : i32
      %23 = arith.addi %22, %c3_i32 : i32
      %c0_16 = arith.constant 0 : index
      %24 = arith.index_cast %23 : i32 to index
      %c0_17 = arith.constant 0 : index
      %c0_18 = arith.constant 0 : index
      %25 = vector.load %arg2[%c0_16, %24, %c0_17, %c0_18] : memref<1x25x16x16xf32, #tpu.memory_space<vmem>>, vector<1x1x16x16xf32>
      %26 = vector.shape_cast %25 : vector<1x1x16x16xf32> to vector<16x16xf32>
      %27 = arith.addi %0, %7 : i32
      %c0_19 = arith.constant 0 : index
      %c0_20 = arith.constant 0 : index
      %28 = arith.index_cast %27 : i32 to index
      %c1 = arith.constant 1 : index
      %29 = vector.load %arg3[%c0_19, %c0_20, %28, %c1] : memref<1x3x20x20xf32, #tpu.memory_space<vmem>>, vector<1x3x16x16xf32>
      %30 = vector.shape_cast %29 : vector<1x3x16x16xf32> to vector<3x16x16xf32>
      %31 = vector.shape_cast %26 : vector<16x16xf32> to vector<1x16x16xf32>
      %32 = vector.broadcast %31 : vector<1x16x16xf32> to vector<3x16x16xf32>
      %33 = arith.mulf %32, %30 : vector<3x16x16xf32>
      %34 = arith.addf %20, %33 : vector<3x16x16xf32>
      %c4_i32_21 = arith.constant 4 : i32
      %35 = arith.subi %c4_i32_21, %7 : i32
      %c5_i32_22 = arith.constant 5 : i32
      %36 = arith.muli %35, %c5_i32_22 : i32
      %c2_i32 = arith.constant 2 : i32
      %37 = arith.addi %36, %c2_i32 : i32
      %c0_23 = arith.constant 0 : index
      %38 = arith.index_cast %37 : i32 to index
      %c0_24 = arith.constant 0 : index
      %c0_25 = arith.constant 0 : index
      %39 = vector.load %arg2[%c0_23, %38, %c0_24, %c0_25] : memref<1x25x16x16xf32, #tpu.memory_space<vmem>>, vector<1x1x16x16xf32>
      %40 = vector.shape_cast %39 : vector<1x1x16x16xf32> to vector<16x16xf32>
      %41 = arith.addi %0, %7 : i32
      %c0_26 = arith.constant 0 : index
      %c0_27 = arith.constant 0 : index
      %42 = arith.index_cast %41 : i32 to index
      %c2 = arith.constant 2 : index
      %43 = vector.load %arg3[%c0_26, %c0_27, %42, %c2] : memref<1x3x20x20xf32, #tpu.memory_space<vmem>>, vector<1x3x16x16xf32>
      %44 = vector.shape_cast %43 : vector<1x3x16x16xf32> to vector<3x16x16xf32>
      %45 = vector.shape_cast %40 : vector<16x16xf32> to vector<1x16x16xf32>
      %46 = vector.broadcast %45 : vector<1x16x16xf32> to vector<3x16x16xf32>
      %47 = arith.mulf %46, %44 : vector<3x16x16xf32>
      %48 = arith.addf %34, %47 : vector<3x16x16xf32>
      %c4_i32_28 = arith.constant 4 : i32
      %49 = arith.subi %c4_i32_28, %7 : i32
      %c5_i32_29 = arith.constant 5 : i32
      %50 = arith.muli %49, %c5_i32_29 : i32
      %c1_i32_30 = arith.constant 1 : i32
      %51 = arith.addi %50, %c1_i32_30 : i32
      %c0_31 = arith.constant 0 : index
      %52 = arith.index_cast %51 : i32 to index
      %c0_32 = arith.constant 0 : index
      %c0_33 = arith.constant 0 : index
      %53 = vector.load %arg2[%c0_31, %52, %c0_32, %c0_33] : memref<1x25x16x16xf32, #tpu.memory_space<vmem>>, vector<1x1x16x16xf32>
      %54 = vector.shape_cast %53 : vector<1x1x16x16xf32> to vector<16x16xf32>
      %55 = arith.addi %0, %7 : i32
      %c0_34 = arith.constant 0 : index
      %c0_35 = arith.constant 0 : index
      %56 = arith.index_cast %55 : i32 to index
      %c3 = arith.constant 3 : index
      %57 = vector.load %arg3[%c0_34, %c0_35, %56, %c3] : memref<1x3x20x20xf32, #tpu.memory_space<vmem>>, vector<1x3x16x16xf32>
      %58 = vector.shape_cast %57 : vector<1x3x16x16xf32> to vector<3x16x16xf32>
      %59 = vector.shape_cast %54 : vector<16x16xf32> to vector<1x16x16xf32>
      %60 = vector.broadcast %59 : vector<1x16x16xf32> to vector<3x16x16xf32>
      %61 = arith.mulf %60, %58 : vector<3x16x16xf32>
      %62 = arith.addf %48, %61 : vector<3x16x16xf32>
      %c4_i32_36 = arith.constant 4 : i32
      %63 = arith.subi %c4_i32_36, %7 : i32
      %c5_i32_37 = arith.constant 5 : i32
      %64 = arith.muli %63, %c5_i32_37 : i32
      %c0_i32_38 = arith.constant 0 : i32
      %65 = arith.addi %64, %c0_i32_38 : i32
      %c0_39 = arith.constant 0 : index
      %66 = arith.index_cast %65 : i32 to index
      %c0_40 = arith.constant 0 : index
      %c0_41 = arith.constant 0 : index
      %67 = vector.load %arg2[%c0_39, %66, %c0_40, %c0_41] : memref<1x25x16x16xf32, #tpu.memory_space<vmem>>, vector<1x1x16x16xf32>
      %68 = vector.shape_cast %67 : vector<1x1x16x16xf32> to vector<16x16xf32>
      %69 = arith.addi %0, %7 : i32
      %c0_42 = arith.constant 0 : index
      %c0_43 = arith.constant 0 : index
      %70 = arith.index_cast %69 : i32 to index
      %c4 = arith.constant 4 : index
      %71 = vector.load %arg3[%c0_42, %c0_43, %70, %c4] : memref<1x3x20x20xf32, #tpu.memory_space<vmem>>, vector<1x3x16x16xf32>
      %72 = vector.shape_cast %71 : vector<1x3x16x16xf32> to vector<3x16x16xf32>
      %73 = vector.shape_cast %68 : vector<16x16xf32> to vector<1x16x16xf32>
      %74 = vector.broadcast %73 : vector<1x16x16xf32> to vector<3x16x16xf32>
      %75 = arith.mulf %74, %72 : vector<3x16x16xf32>
      %76 = arith.addf %62, %75 : vector<3x16x16xf32>
      %c0_44 = arith.constant 0 : index
      %c0_45 = arith.constant 0 : index
      %c0_46 = arith.constant 0 : index
      %c0_47 = arith.constant 0 : index
      %77 = vector.load %arg4[%c0_44, %c0_45, %c0_46, %c0_47] : memref<1x3x16x16xf32, #tpu.memory_space<vmem>>, vector<1x3x16x16xf32>
      %78 = vector.shape_cast %77 : vector<1x3x16x16xf32> to vector<3x16x16xf32>
      %79 = arith.addf %78, %76 : vector<3x16x16xf32>
      %c0_48 = arith.constant 0 : index
      %c0_49 = arith.constant 0 : index
      %c0_50 = arith.constant 0 : index
      %c0_51 = arith.constant 0 : index
      %80 = vector.load %arg4[%c0_48, %c0_49, %c0_50, %c0_51] : memref<1x3x16x16xf32, #tpu.memory_space<vmem>>, vector<1x3x16x16xf32>
      %81 = vector.shape_cast %80 : vector<1x3x16x16xf32> to vector<3x16x16xf32>
      %82 = vector.shape_cast %79 : vector<3x16x16xf32> to vector<1x3x16x16xf32>
      tpu.vector_store %arg4[%c0_48, %c0_49, %c0_50, %c0_51], %82 {strides = array<i32>} : memref<1x3x16x16xf32, #tpu.memory_space<vmem>>, vector<1x3x16x16xf32>,
    }
    %c5_i32_3 = arith.constant 5 : i32
    return
  }
  func.func @transform_0(%arg0: i32, %arg1: i32) -> (i32, i32, i32, i32) {
    %c0_i32 = arith.constant 0 : i32
    %c0_i32_0 = arith.constant 0 : i32
    %c0_i32_1 = arith.constant 0 : i32
    return %arg0, %c0_i32, %arg1, %c0_i32_0 : i32, i32, i32, i32
  }
  func.func @transform_1(%arg0: i32, %arg1: i32) -> (i32, i32, i32, i32) {
    %c0_i32 = arith.constant 0 : i32
    %c0_i32_0 = arith.constant 0 : i32
    %c0_i32_1 = arith.constant 0 : i32
    %c0_i32_2 = arith.constant 0 : i32
    return %arg0, %c0_i32, %c0_i32_0, %c0_i32_1 : i32, i32, i32, i32
  }
  func.func @transform_2(%arg0: i32, %arg1: i32) -> (i32, i32, i32, i32) {
    %c0_i32 = arith.constant 0 : i32
    %c0_i32_0 = arith.constant 0 : i32
    %c0_i32_1 = arith.constant 0 : i32
    return %arg0, %c0_i32, %arg1, %c0_i32_0 : i32, i32, i32, i32
  }
}

</mosaic_0001>

<bundles_post_ra>
// kernel: kernel_conv.1
= control target key start
LH: loop header
LB: loop body
LE: loop exit
PB: predicated region body
PF: predicated region fallthrough
CT: control target
= control target key end

     0   :  { %7 = vsyncpa [#allocation3], 0  ;;  %s1027_s0 = inlined_call_operand.hbm [shape: f32[2,25,16,16], index: 0, kind: input, shape index: {}]   ;;  %s1028_s1 = inlined_call_operand.vmem [shape: f32[2,3,20,20], index: 1, kind: input, shape index: {}]   ;;  %s1029_s2 = inlined_call_operand.hbm [shape: f32[2,3,16,16], index: 2, kind: output, shape index: {}]  }
   0x1   :  { %9 = vsyncpa [#allocation3 + $0x1], 0 }
   0x2   :  { %10 = vsyncpa [#allocation4], 0 }
   0x3   :  { %12 = vsyncpa [#allocation4 + $0x1], 0  ;;  %s799_s9 = smov 0   ;;  %s801_s10 = smov 0  }
   0x4   :  { %s803_s11 = smov 0   ;;  %s805_s12 = smov 0  }
   0x5   :  { %s807_s13 = smov 0   ;;  %s809_s14 = smov 0  }
   0x6 LB: > { %s545_s15 = sadd.s32 4294967295, %s769_s14   ;;  %s546_s16 = sadd.s32 4294967294, %s769_s14   ;;  %s769_s14 = sphi %s809_s14, %s18_s14   ;;  %s765_s13 = sphi %s807_s13, %s1038_s13   ;;  %s761_s12 = sphi %s805_s12, %s1037_s12   ;;  %s757_s11 = sphi %s803_s11, %s1036_s11   ;;  %s753_s10 = sphi %s801_s10, %s1035_s10   ;;  %s749_s9 = sphi %s799_s9, %s1034_s9  }
   0x7   : > { %s30_s17 = sadd.s32 1, %s765_s13  ;;  %s39_s18 = sadd.s32 1, %s757_s11 }
   0x8   : > { %p32_p0 = scmp.ge.s32.totalorder %s30_s17, 2  ;;  %p46_p1 = scmp.ne.s32.totalorder %s757_s11, %s753_s10 }
   0x9   : > { %p47_p2 = scmp.eq.s32.totalorder %s769_s14, 0  ;;  %p52_p3 = scmp.ne.s32.totalorder %s753_s10, %s749_s9 }
   0xa   : > { %s1040_s17 = smov (%p32_p0, %s30_s17), 0  ;;  %p53_p5 = scmp.eq.s32.totalorder %s545_s15, 0 }
   0xb   : > { %p840_p4 = por %p47_p2, %p46_p1  ;;  %s34_s20 = ssub.s32 %s765_s13, %s1040_s17 }
   0xc   : > { %p104_p6 = scmp.eq.s32.totalorder %s545_s15, 1  ;;  %p37_p7 = scmp.eq.s32.totalorder %s34_s20, 0 }
   0xd   : > { %p846_p8 = por %p53_p5, %p52_p3  ;;  %p110_p10 = scmp.eq.s32.totalorder %s546_s16, 1 }
   0xe   : > { %p850_p9 = por %p104_p6, %p46_p1  ;;  %p548_p12 = scmp.ge.s32.totalorder %s769_s14, 2 }
   0xf   : > { %s855_s23 = scalar_select %p37_p7, %s757_s11, %s39_s18  }
  0x10   : > { %p857_p11 = por %p110_p10, %p52_p3  ;;  %p586_p13 = scmp.lt.s32.totalorder %s769_s14, 2 }
  0x11   : > { %s130_s25 = sand.u32 1, %s757_s11   ;;  %s569_s27 = smul.u32 400, %s765_s13 }
  0x12   : > { %s568_s26 = smul.u32 400, %s130_s25  ;;  %p579_p0 = pnand %p586_p13, %p840_p4 }
  0x13   : > { %s141_s30 = scalar_lea.hbm %s1027_s0, %s569_s27  ;;  %p550_p1 = scmp.ge.s32.totalorder %s769_s14, 1 }
  0x14   : > { %s134_s3 = scalar_lea.vmem [#allocation2], %s568_s26  ;;  %s142_s5 = sshll.u32 %s141_s30, 4  ;;  %s143_s5 = int_to_ptr.hbm [resolvable:$true] %s142_s5 }
  0x15   : > { %s144_s4 = sshll.u32 %s134_s3, 4  ;;  %s131_s6 = scalar_lea.sflag [#allocation3], %s130_s25  ;;  %s145_s4 = int_to_ptr.vmem [resolvable:$true] %s144_s4 }
  0x16   : > { %s775_s7 = smov 128   ;;  %s776_s8 = smov 8  }
  0x17   : > { %581 = dma.hbm_to_vmem [thread:$0]  (!%p579_p0), %s143_s5, 6400, %s145_s4, %s131_s6, %s775_s7, %s775_s7, %s776_s8  }
  0x18   : > { %p160_p2 = scmp.lt.s32.totalorder %s769_s14, 3 }
  0x1a   : > { %p161_p3 = pnand %p550_p1, %p160_p2 }
  0x1b   : > { %s873_s15 = sand.u32 (!%p161_p3), 1, %s753_s10  }
  0x1c   : > { %164 = sbr.rel (%p161_p3) target bundleno = 228 (0xe4), region = 28  ;;  %s167_s18 = scalar_lea.sflag (!%p161_p3), [#allocation3], %s873_s15 }
  0x1d   : > { %s570_s16 = smul.u32 (!%p161_p3), 400, %s873_s15 }
  0x1f   : > { %s877_s19 = scalar_lea.vmem (!%p161_p3), [#allocation2], %s570_s16 }
  0x21   : > { %740 = dma.done.wait (%p846_p8), %s167_s18, 6400  }
  0x22   : > { %742 = vsyncadd (%p846_p8), %s167_s18, 4294960896  ;;  %s571_s20 = smul.u32 48, %s873_s15  ;;  %p198_p4 = scmp.lt.s32.totalorder %s761_s12, 1  ;;  %vm205_vm0 = vcmask 130048   ;;  %v777_v0 = vmov 0.0  }
  0x23   : > { %s905_s30 = smov 0  }
  0x24   : > { %s199_s25 = scalar_select %p198_p4, %s761_s12, 1 }
  0x25   : > { %s886_s26 = scalar_lea.vmem [#allocation5], %s571_s20 }
  0x26   : > { %206 = vst.msk [vmem:[%s886_s26] sm:$0xff] %vm205_vm0, %v777_v0  ;;  %s572_s21 = smul.u32 72, %s199_s25 }
  0x27   : > { %207 = vst.msk [vmem:[%s886_s26 + $0x8] sm:$0xff] %vm205_vm0, %v777_v0 }
  0x28   : > { %208 = vst.msk [vmem:[%s886_s26 + $0x10] sm:$0xff] %vm205_vm0, %v777_v0  ;;  %s899_s29 = scalar_lea.vmem %s1028_s1, %s572_s21 }
  0x29   : > { %209 = vst.msk [vmem:[%s886_s26 + $0x18] sm:$0xff] %vm205_vm0, %v777_v0 }
  0x2a   : > { %210 = vst.msk [vmem:[%s886_s26 + $0x20] sm:$0xff] %vm205_vm0, %v777_v0 }
  0x2b   : > { %211 = vst.msk [vmem:[%s886_s26 + $0x28] sm:$0xff] %vm205_vm0, %v777_v0 }
  0x2c LB: >> { %s226_s3 = scalar_lea.vmem %s899_s29, %s773_s30  ;;  %s778_s4 = smov 127   ;;  %s773_s30 = sphi %s905_s30, %s217_s30  }
  0x2d   : >> { %v231_v1 = vld [vmem:[%s226_s3 + $0x30] sm:$0xff]  ;;  %v229_v2 = vld [vmem:[%s226_s3 + $0x18] sm:$0xff]  ;;  %v912_v3 = vld [vmem:[%s226_s3] sm:$0xff]  ;;  %s779_s5 = smov 126   ;;  %s780_s6 = smov 125  }
  0x2e   : >> { %258 = vrot.lane.b32.xlu2 %v231_v1, %s778_s4  ;;  %254 = vrot.lane.b32.xlu1 %v229_v2, %s778_s4  ;;  %v232_v4 = vld [vmem:[%s226_s3 + $0x38] sm:$0xff]  ;;  %v915_v5 = vld [vmem:[%s226_s3 + $0x20] sm:$0xff]  ;;  %s218_s7 = ssub.s32 4, %s773_s30  ;;  %s781_s8 = smov 124  }
  0x2f   : >> { %250 = vrot.lane.b32.xlu0 %v912_v3, %s778_s4  ;;  %v917_v6 = vld [vmem:[%s226_s3 + $0x8] sm:$0xff]  ;;  %s552_s16 = smul.u32 80, %s218_s7  ;;  %v386_v50 = vld [vmem:[%s886_s26 + $0x10] sm:$0xff]  ;;  %s217_s30 = sadd.s32 1, %s773_s30  }
  0x30   : >> { %p214_p5 = scmp.ge.s32.totalorder %s217_s30, 5  }
  0x31   : >> { %s931_s18 = scalar_lea.vmem %s877_s19, %s552_s16 [#allocation2]  ;;  %s573_s20 = smul.u32 (%p214_p5), 48, %s761_s12 }
  0x32   : >> { %v553_v7 = vld [vmem:[%s931_s18 + $0x40] sm:$0xff]  ;;  %v936_v9 = vld [vmem:[%s931_s18 + $0x48] sm:$0xff]  ;;  %v556_v11 = vld [vmem:[%s931_s18 + $0x30] sm:$0xff]  ;;  %s417_s25 = sshll.u32 (%p214_p5), %s886_s26, 4  ;;  %s703_s12 = scalar_lea.hbm (%p214_p5), %s1029_s2, 96  ;;  %s418_s25 = int_to_ptr.vmem [resolvable:$true] %s417_s25 }
  0x33   : >> { %v237_v8 = vmul.f32 %v553_v7, %v231_v1  ;;  %v238_v10 = vmul.f32 %v936_v9, %v232_v4  ;;  %v941_v15 = vld [vmem:[%s931_s18 + $0x38] sm:$0xff]  ;;  %v945_v20 = vld [vmem:[%s931_s18 + $0x28] sm:$0xff]  ;;  %v235_v30 = vmul.f32 %v553_v7, %v229_v2  ;;  %v559_v32 = vld [vmem:[%s931_s18 + $0x20] sm:$0xff]  ;;  %v234_v63 = vmul.f32 %v936_v9, %v917_v6  ;;  %s416_s28 = scalar_lea.hbm (%p214_p5), %s1029_s2, %s573_s20 }
  0x34   : >> { %v949_v29 = vld [vmem:[%s931_s18 + $0x18] sm:$0xff]  ;;  %v562_v37 = vld [vmem:[%s931_s18 + $0x10] sm:$0xff]  ;;  %v352_v42 = vld [vmem:[%s931_s18] sm:$0xff]  ;;  %s419_s3 = sshll.u32 (%p214_p5), %s416_s28, 4  ;;  %s420_s3 = int_to_ptr.hbm [resolvable:$true] %s419_s3 }
  0x35   : >> { %v353_v54 = vld [vmem:[%s931_s18 + $0x8] sm:$0xff] }
  0x36   : >> { %260 = vrot.lane.b32.xlu2 %v232_v4, %s778_s4  ;;  %256 = vrot.lane.b32.xlu1 %v915_v5, %s778_s4  ;;  %v389_v59 = vld [vmem:[%s886_s26 + $0x28] sm:$0xff] }
  0x37   : >> { %252 = vrot.lane.b32.xlu0 %v917_v6, %s778_s4  ;;  %s403_s4 = scalar_lea.sflag (%p214_p5), [#allocation4], %s873_s15 }
  0x3e   : >> { %289 = vrot.lane.b32.xlu2 %v229_v2, %s779_s5  ;;  %287 = vrot.lane.b32.xlu1 %v917_v6, %s779_s5 }
  0x3f   : >> { %285 = vrot.lane.b32.xlu0 %v912_v3, %s779_s5 }
  0x46   : >> { %295 = vrot.lane.b32.xlu2 %v232_v4, %s779_s5  ;;  %293 = vrot.lane.b32.xlu1 %v231_v1, %s779_s5 }
  0x47   : >> { %291 = vrot.lane.b32.xlu0 %v915_v5, %s779_s5  ;;  %s697_s5 = sshra.s32 (%p214_p5), %s420_s3, 4  ;;  %s698_s5 = int_to_ptr.hbm [resolvable:$true] %s697_s5 }
  0x48   : > { %p704_p10 = scmp.lt.s32.totalorder (%p214_p5), %s698_s5, %s1029_s2 }
  0x4e   : >> { %324 = vrot.lane.b32.xlu2 %v229_v2, %s780_s6  ;;  %322 = vrot.lane.b32.xlu1 %v917_v6, %s780_s6 }
  0x4f   : >> { %320 = vrot.lane.b32.xlu0 %v912_v3, %s780_s6 }
  0x56   : >> { %330 = vrot.lane.b32.xlu2 %v232_v4, %s780_s6  ;;  %328 = vrot.lane.b32.xlu1 %v231_v1, %s780_s6 }
  0x57   : >> { %326 = vrot.lane.b32.xlu0 %v915_v5, %s780_s6  ;;  %s699_s6 = scalar_lea.hbm (%p214_p5), %s698_s5, 48 }
  0x58   : > { %p700_p6 = scmp.ne.s32.totalorder (%p214_p5), %s698_s5, %s699_s6  ;;  %p705_p13 = scmp.lt.s32.totalorder (%p214_p5), %s703_s12, %s699_s6 }
  0x5a   : > { %p701_p7 = pnand (%p214_p5), %p700_p6, %p850_p9  ;;  %p706_p0 = por (%p214_p5), %p705_p13, %p704_p10 }
  0x5c   : > { %p702_p8 = pneg (%p214_p5), %p701_p7 }
  0x5e   : >> { %358 = vrot.lane.b32.xlu2 %v229_v2, %s781_s8  ;;  %356 = vrot.lane.b32.xlu1 %v917_v6, %s781_s8  ;;  %p707_p1 = pnand (%p214_p5), %p706_p0, %p702_p8 }
  0x5f   : >> { %354 = vrot.lane.b32.xlu0 %v912_v3, %s781_s8 }
  0x66   : >> { %364 = vrot.lane.b32.xlu2 %v232_v4, %s781_s8  ;;  %362 = vrot.lane.b32.xlu1 %v231_v1, %s781_s8  ;;  %v233_v4 = vmul.f32 %v553_v7, %v912_v3  ;;  %v236_v3 = vmul.f32 %v936_v9, %v915_v5 }
  0x67   : >> { %360 = vrot.lane.b32.xlu0 %v915_v5, %s781_s8 }
  0x88   : >> { %v259_v12 = vpop.permute.xlu2 %258 }
  0x89   : >> { %v272_v13 = vmul.f32 %v556_v11, %v259_v12 }
  0x8b   : >> { %v278_v14 = vadd.f32 %v272_v13, %v237_v8 }
  0x90   : >> { %v261_v16 = vpop.permute.xlu2 %260 }
  0x91   : >> { %v273_v17 = vmul.f32 %v941_v15, %v261_v16 }
  0x93   : >> { %v279_v18 = vadd.f32 %v273_v17, %v238_v10 }
  0x98   : >> { %v290_v19 = vpop.permute.xlu2 %289 }
  0x99   : >> { %v305_v38 = vmul.f32 %v559_v32, %v290_v19 }
  0xa0   : >> { %v296_v21 = vpop.permute.xlu2 %295  ;;  %v255_v22 = vpop.permute.xlu1 %254 }
  0xa1   : >> { %v308_v23 = vmul.f32 %v945_v20, %v296_v21  ;;  %v251_v24 = vpop.permute.xlu0 %250  ;;  %v270_v31 = vmul.f32 %v556_v11, %v255_v22 }
  0xa2   : >> { %v268_v8 = vmul.f32 %v556_v11, %v251_v24  ;;  %v385_v24 = vld [vmem:[%s886_s26 + $0x8] sm:$0xff] }
  0xa3   : >> { %v314_v25 = vadd.f32 %v308_v23, %v279_v18  ;;  %v276_v39 = vadd.f32 %v270_v31, %v235_v30  ;;  %v384_v30 = vld [vmem:[%s886_s26] sm:$0xff] }
  0xa4   : >> { %v274_v17 = vadd.f32 %v268_v8, %v233_v4 }
  0xa5   : >> { %v311_v43 = vadd.f32 %v305_v38, %v276_v39  ;;  %v388_v38 = vld [vmem:[%s886_s26 + $0x20] sm:$0xff] }
  0xa8   : >> { %v325_v26 = vpop.permute.xlu2 %324  ;;  %v257_v27 = vpop.permute.xlu1 %256 }
  0xa9   : >> { %v253_v28 = vpop.permute.xlu0 %252  ;;  %v340_v41 = vmul.f32 %v562_v37, %v325_v26  ;;  %v271_v7 = vmul.f32 %v941_v15, %v257_v27 }
  0xaa   : >> { %v269_v0 = vmul.f32 %v941_v15, %v253_v28 }
  0xab   : >> { %v346_v46 = vadd.f32 %v340_v41, %v311_v43 }
  0xb0   : >> { %v331_v33 = vpop.permute.xlu2 %330  ;;  %v288_v34 = vpop.permute.xlu1 %287 }
  0xb1   : >> { %v343_v35 = vmul.f32 %v949_v29, %v331_v33  ;;  %v286_v36 = vpop.permute.xlu0 %285  ;;  %v304_v10 = vmul.f32 %v945_v20, %v288_v34  ;;  %v277_v34 = vadd.f32 %v271_v7, %v236_v3 }
  0xb2   : >> { %v303_v13 = vmul.f32 %v559_v32, %v286_v36 }
  0xb3   : >> { %v349_v40 = vadd.f32 %v343_v35, %v314_v25 }
  0xb4   : >> { %v309_v6 = vadd.f32 %v303_v13, %v274_v17 }
  0xb8   : >> { %v359_v44 = vpop.permute.xlu2 %358  ;;  %v294_v45 = vpop.permute.xlu1 %293 }
  0xb9   : >> { %v374_v47 = vmul.f32 %v359_v44, %v352_v42  ;;  %v307_v48 = vmul.f32 %v559_v32, %v294_v45  ;;  %v292_v49 = vpop.permute.xlu0 %291 }
  0xba   : >> { %v306_v31 = vmul.f32 %v945_v20, %v292_v49 }
  0xbb   : >> { %v380_v51 = vadd.f32 %v374_v47, %v346_v46  ;;  %v313_v52 = vadd.f32 %v307_v48, %v278_v14  ;;  %v275_v14 = vadd.f32 %v269_v0, %v234_v63 }
  0xbc   : >> { %v312_v5 = vadd.f32 %v306_v31, %v277_v34 }
  0xbd   : >> { %v392_v53 = vadd.f32 %v386_v50, %v380_v51  ;;  %v310_v19 = vadd.f32 %v304_v10, %v275_v14 }
  0xbf   : >> { %398 = vst.msk [vmem:[%s886_s26 + $0x10] sm:$0xff] %vm205_vm0, %v392_v53 }
  0xc0   : >> { %v365_v55 = vpop.permute.xlu2 %364  ;;  %v323_v56 = vpop.permute.xlu1 %322 }
  0xc1   : >> { %v377_v57 = vmul.f32 %v365_v55, %v353_v54  ;;  %v321_v58 = vpop.permute.xlu0 %320  ;;  %v339_v16 = vmul.f32 %v949_v29, %v323_v56 }
  0xc2   : >> { %v338_v18 = vmul.f32 %v562_v37, %v321_v58 }
  0xc3   : >> { %v383_v60 = vadd.f32 %v377_v57, %v349_v40  ;;  %v345_v22 = vadd.f32 %v339_v16, %v310_v19  ;;  %v387_v40 = vld [vmem:[%s886_s26 + $0x18] sm:$0xff] }
  0xc4   : >> { %v344_v11 = vadd.f32 %v338_v18, %v309_v6 }
  0xc5   : >> { %v395_v61 = vadd.f32 %v389_v59, %v383_v60 }
  0xc7   : >> { %401 = vst.msk [vmem:[%s886_s26 + $0x28] sm:$0xff] %vm205_vm0, %v395_v61 }
  0xc8   : >> { %v329_v62 = vpop.permute.xlu1 %328 }
  0xc9   : >> { %v342_v1 = vmul.f32 %v562_v37, %v329_v62  ;;  %v327_v2 = vpop.permute.xlu0 %326 }
  0xca   : >> { %v341_v35 = vmul.f32 %v949_v29, %v327_v2 }
  0xcb   : >> { %v348_v12 = vadd.f32 %v342_v1, %v313_v52 }
  0xcc   : >> { %v347_v37 = vadd.f32 %v341_v35, %v312_v5 }
  0xd0   : >> { %v357_v21 = vpop.permute.xlu1 %356 }
  0xd1   : >> { %v373_v23 = vmul.f32 %v357_v21, %v353_v54  ;;  %v355_v25 = vpop.permute.xlu0 %354 }
  0xd2   : >> { %v372_v26 = vmul.f32 %v355_v25, %v352_v42 }
  0xd3   : >> { %v379_v28 = vadd.f32 %v373_v23, %v345_v22 }
  0xd4   : >> { %v378_v32 = vadd.f32 %v372_v26, %v344_v11 }
  0xd5   : >> { %v391_v33 = vadd.f32 %v385_v24, %v379_v28 }
  0xd6   : >> { %v390_v36 = vadd.f32 %v384_v30, %v378_v32 }
  0xd7   : >> { %397 = vst.msk [vmem:[%s886_s26 + $0x8] sm:$0xff] %vm205_vm0, %v391_v33 }
  0xd8   : >> { %396 = vst.msk [vmem:[%s886_s26] sm:$0xff] %vm205_vm0, %v390_v36  ;;  %v363_v9 = vpop.permute.xlu1 %362 }
  0xd9   : >> { %v376_v15 = vmul.f32 %v363_v9, %v352_v42  ;;  %v361_v27 = vpop.permute.xlu0 %360 }
  0xda   : >> { %v375_v20 = vmul.f32 %v361_v27, %v353_v54 }
  0xdb   : >> { %v382_v39 = vadd.f32 %v376_v15, %v348_v12 }
  0xdc   : >> { %v381_v41 = vadd.f32 %v375_v20, %v347_v37  ;;  %216 = sbr.rel (!%p214_p5) target bundleno = 44 (0x2c), region = 89 }
  0xdd   : >> { %v394_v43 = vadd.f32 %v388_v38, %v382_v39 }
  0xde   : >> { %v393_v44 = vadd.f32 %v387_v40, %v381_v41 }
  0xdf   : >> { %400 = vst.msk [vmem:[%s886_s26 + $0x20] sm:$0xff] %vm205_vm0, %v394_v43 }
  0xe0   : >> { %399 = vst.msk [vmem:[%s886_s26 + $0x18] sm:$0xff] %vm205_vm0, %v393_v44 }
  0xe1   : > { %710 = shalt.err (!%p707_p1)
}
  0xe2   : > { %s782_s15 = smov 128   ;;  %s783_s7 = smov 8  }
  0xe3   : > { %576 = dma.vmem_to_hbm [thread:$0]  (%p850_p9), %s418_s25, 768, %s420_s3, %s403_s4, %s782_s15, %s782_s15, %s783_s7  }
  0xe4 PF: > { %s434_s8 = sand.u32 1, %s749_s9   ;;  %p583_p2 = pnand %p548_p12, %p857_p11 }
  0xe5   : > { %s435_s16 = scalar_lea.sflag [#allocation4], %s434_s8 }
  0xe6   : > { %p584_p3 = pneg %p583_p2 }
  0xe8   : > { %744 = dma.done.wait (%p584_p3), %s435_s16, 768  }
  0xe9   : > { %746 = vsyncadd (%p584_p3), %s435_s16, 4294966528  ;;  %s18_s14 = sadd.s32 1, %s769_s14   ;;  %s1034_s9 = smov %s753_s10 }
  0xea   : > { %p15_p4 = scmp.ge.s32.totalorder %s18_s14, 4   ;;  %s1035_s10 = smov %s757_s11 }
  0xeb   : > { %s1036_s11 = smov %s855_s23  ;;  %s1037_s12 = smov %s765_s13 }
  0xec   : > { %s1038_s13 = smov %s1040_s17  ;;  %17 = sbr.rel (!%p15_p4) target bundleno = 6 (0x6), region = 100 }
  0xf1   :  { %441 = vsyncpa [#allocation3], 1 }
  0xf2   :  { %443 = vsyncpa [#allocation3 + $0x1], 1 }
  0xf3   :  { %444 = vsyncpa [#allocation4], 1 }
  0xf4   :  { %446 = vsyncpa [#allocation4 + $0x1], 1 }

</bundles_post_ra>
